<compile_context>
chip_gen: v6e
topology: v6e:2x2x1
jax: 0.10.0
libtpu: 0.0.40
codegen_flags: <defaults>
</compile_context>

<pallas_src>
import jax
import jax.numpy as jnp
from jax.experimental import pallas as pl
from jax.experimental.pallas import tpu as pltpu

EPS = 1e-5
TARGET_ROWS = 1024        # patch rows per grid step to aim for (sweep 512-2048)
MAX_TILE_PATCHES = 2048   # cap on the patch-axis tile (VMEM)


def _choose_tiles(B, n_p):
    """Pick (tile_b, tile_np): ~TARGET_ROWS rows per step, the in-kernel
    (tile_b, tile_np) -> rows merge stays a free metadata reshape
    (tile_np % 8 == 0 or tile_b == 1), and >= 2 grid steps when B >= 2."""
    tile_np = n_p if n_p <= MAX_TILE_PATCHES else (MAX_TILE_PATCHES // 8) * 8
    tile_b = max(1, min(B, TARGET_ROWS // max(tile_np, 1)))
    if tile_b > 1 and tile_np % 8 != 0:
        if n_p >= 8:
            # spread the patch axis over multiple-of-8 tiles with minimal padding
            n_pt = pl.cdiv(n_p, (tile_np // 8) * 8)
            tile_np = 8 * pl.cdiv(n_p, 8 * n_pt)
            tile_b = max(1, min(B, TARGET_ROWS // max(tile_np, 1)))
        if tile_np % 8 != 0 or tile_np > n_p:
            tile_b, tile_np = 1, n_p       # fall back: single-batch blocks
    if B >= 2 and pl.cdiv(B, tile_b) * pl.cdiv(n_p, tile_np) < 2:
        tile_b = pl.cdiv(B, 2)             # keep both v7x TensorCores busy
    return tile_b, tile_np


def patch_embed_kernel(x_ref, g1_ref, b1_ref, w_ref, bl_ref, g2_ref, b2_ref, o_ref):
    """One (tile_b, tile_np) block: LayerNorm(patch_dim) -> Linear -> LayerNorm(embed).

    The activation block arrives in its natural HBM layout (tile_b, C, tile_np, ps).
    The channel-major (c, ps) element order of each patch is matched by the
    pre-permuted LN1 affine / Linear weight rows, so no transpose is ever
    materialized; the Linear is accumulated channel-by-channel on the MXU in f32.
    """
    tb, C, tn, ps = x_ref.shape
    R = tb * tn
    E = w_ref.shape[2]
    inv_pd = 1.0 / float(C * ps)

    def slab(c):
        # channel-c slab as a (rows, ps) f32 matrix; merging (tb, tn) -> rows is a
        # pure metadata reshape (tn multiple of 8, or tb == 1, by construction).
        return x_ref[:, c, :, :].astype(jnp.float32).reshape(R, ps)

    # ---- LayerNorm(patch_dim): two-pass mean/var.  Summing per-channel row
    #      sums gives exactly the statistics of the flattened (ps*c) patch. ----
    s1 = jnp.zeros((R, 1), jnp.float32)
    for c in range(C):
        s1 = s1 + jnp.sum(slab(c), axis=-1, keepdims=True)
    mu = s1 * inv_pd
    s2 = jnp.zeros((R, 1), jnp.float32)
    for c in range(C):
        d = slab(c) - mu
        s2 = s2 + jnp.sum(d * d, axis=-1, keepdims=True)
    rstd = jax.lax.rsqrt(s2 * inv_pd + EPS)

    # ---- Linear(patch_dim -> embed): per-channel (rows, ps) @ (ps, E) MXU
    #      accumulation in f32 (columns pre-permuted wrapper-side). ----
    acc = jnp.zeros((R, E), jnp.float32)
    for c in range(C):
        h = (slab(c) - mu) * rstd * g1_ref[c] + b1_ref[c]          # (R, ps), f32
        acc = acc + jnp.dot(h.astype(w_ref.dtype), w_ref[c],
                            preferred_element_type=jnp.float32)
    y = acc + bl_ref[...].astype(jnp.float32)

    # ---- LayerNorm(embed_dim) ----
    mu2 = jnp.mean(y, axis=-1, keepdims=True)
    var2 = jnp.mean((y - mu2) ** 2, axis=-1, keepdims=True)
    out = (y - mu2) * jax.lax.rsqrt(var2 + EPS) * g2_ref[...] + b2_ref[...]
    o_ref[...] = out.reshape(tb, tn, E).astype(o_ref.dtype)


def patch_flattened_embed(x, params, patch_size):
    """x: (B, C, S) -> (B, S // patch_size, embed_dim).

    The only wrapper-side ops are free reshapes of x and one-time permutes of
    the (tiny) parameters; activations are never copied/transposed in HBM.
    """
    B, C, S = x.shape
    assert S % patch_size == 0, "patch_size must divide signal length"
    ps = patch_size
    n_p = S // ps
    patch_dim = C * ps
    E = params["w"].shape[1]

    # (B, C, S) -> (B, C, n_p, ps): pure metadata reshape, no HBM traffic.
    x4 = x.reshape(B, C, n_p, ps)

    # One-time parameter permutation (ps, c) -> (c, ps).  LN1 statistics are
    # permutation-invariant, so consuming activations channel-major with these
    # permuted params is exactly the einops 'b c (np ps) -> b np (ps c)' model.
    g1p = params["ln1_w"].reshape(ps, C).T.reshape(C, 1, ps)
    b1p = params["ln1_b"].reshape(ps, C).T.reshape(C, 1, ps)
    wp = params["w"].reshape(ps, C, E).transpose(1, 0, 2)           # (C, ps, E)
    bl = params["b"].reshape(1, E)
    g2 = params["ln2_w"].reshape(1, E)
    b2 = params["ln2_b"].reshape(1, E)

    tile_b, tile_np = _choose_tiles(B, n_p)
    nb, nt = pl.cdiv(B, tile_b), pl.cdiv(n_p, tile_np)

    def full_spec(shape):
        return pl.BlockSpec(shape, lambda ib, it: (0,) * len(shape))

    in_specs = [
        pl.BlockSpec((tile_b, C, tile_np, ps), lambda ib, it: (ib, 0, it, 0)),
        full_spec((C, 1, ps)), full_spec((C, 1, ps)),   # LN1 gamma / beta (permuted)
        full_spec((C, ps, E)),                          # Linear weight (rows permuted)
        full_spec((1, E)),                              # Linear bias
        full_spec((1, E)), full_spec((1, E)),           # LN2 gamma / beta
    ]
    out_spec = pl.BlockSpec((tile_b, tile_np, E), lambda ib, it: (ib, it, 0))

    rows = B * n_p
    itm = x.dtype.itemsize
    pitm = params["w"].dtype.itemsize
    cost = pl.CostEstimate(
        flops=2 * rows * patch_dim * E + 10 * rows * (patch_dim + E),
        transcendentals=2 * rows,
        bytes_accessed=x.size * itm + rows * E * itm
        + (patch_dim * E + 2 * patch_dim + 3 * E) * pitm)

    # VMEM budget: double-buffered x/out tiles + params + f32 temporaries;
    # capped at 48 MiB so it also fits v7x's 64 MiB physical VMEM per core.
    xb = tile_b * C * tile_np * ps * itm
    ob = tile_b * tile_np * E * itm
    prm = (C * ps * E + 2 * C * ps + 3 * E) * pitm
    tmp = tile_b * tile_np * (3 * E + 2 * max(ps, 128)) * 4
    vmem_limit = int(min(48 << 20,
                         max(16 << 20, 2 * (xb + ob) + 2 * prm + tmp + (4 << 20))))

    return pl.pallas_call(
        patch_embed_kernel,
        out_shape=jax.ShapeDtypeStruct((B, n_p, E), x.dtype),
        grid=(nb, nt),
        in_specs=in_specs,
        out_specs=out_spec,
        compiler_params=pltpu.CompilerParams(
            dimension_semantics=("parallel", "parallel"),
            vmem_limit_bytes=vmem_limit),
        cost_estimate=cost,
    )(x4, g1p, b1p, wp, bl, g2, b2)


def reference_patch_embed(x, p, patch_size):
    """Pure-JAX reference mirroring the PyTorch forward (for sanity check)."""
    B, C, S = x.shape
    n_p = S // patch_size
    xr = (x.reshape(B, C, n_p, patch_size)
           .transpose(0, 2, 3, 1)
           .reshape(B, n_p, C * patch_size))

    def ln(v, w, b):
        mu = v.mean(-1, keepdims=True)
        var = ((v - mu) ** 2).mean(-1, keepdims=True)
        return (v - mu) / jnp.sqrt(var + EPS) * w + b

    h = ln(xr, p["ln1_w"], p["ln1_b"])
    y = h @ p["w"] + p["b"]
    return ln(y, p["ln2_w"], p["ln2_b"])


if __name__ == "__main__":
    # Small shapes consistent with the module: batch=2, in_chans=4,
    # signal=64, patch_size=8 -> num_patches=8, patch_dim=32, embed_dim=32.
    B, C = 2, 4
    PATCH = 8
    SIGNAL = 64
    EMBED = 32
    PATCH_DIM = C * PATCH

    key = jax.random.PRNGKey(0)
    ks = jax.random.split(key, 7)
    params = {
        "ln1_w": 1.0 + 0.05 * jax.random.normal(ks[0], (PATCH_DIM,), jnp.float32),
        "ln1_b": 0.05 * jax.random.normal(ks[1], (PATCH_DIM,), jnp.float32),
        "w":     0.05 * jax.random.normal(ks[2], (PATCH_DIM, EMBED), jnp.float32),
        "b":     0.05 * jax.random.normal(ks[3], (EMBED,), jnp.float32),
        "ln2_w": 1.0 + 0.05 * jax.random.normal(ks[4], (EMBED,), jnp.float32),
        "ln2_b": 0.05 * jax.random.normal(ks[5], (EMBED,), jnp.float32),
    }
    x = jax.random.normal(ks[6], (B, C, SIGNAL), jnp.float32)

    # f32 path (tight parity with the reference).
    out = jax.block_until_ready(patch_flattened_embed(x, params, PATCH))
    ref = reference_patch_embed(x, params, PATCH)
    assert out.shape == (B, SIGNAL // PATCH, EMBED)
    assert jnp.allclose(out, ref, atol=1e-4, rtol=1e-4), "mismatch vs JAX reference"

    # bf16 production path (halved HBM traffic; f32 LN stats / accumulation inside).
    xb = x.astype(jnp.bfloat16)
    pb = {k: v.astype(jnp.bfloat16) for k, v in params.items()}
    out_bf = jax.block_until_ready(patch_flattened_embed(xb, pb, PATCH))
    ref_bf = reference_patch_embed(
        xb.astype(jnp.float32),
        {k: v.astype(jnp.float32) for k, v in pb.items()}, PATCH)
    assert out_bf.dtype == jnp.bfloat16
    assert jnp.allclose(out_bf.astype(jnp.float32), ref_bf, atol=5e-2, rtol=5e-2), \
        "bf16 path mismatch vs JAX reference"

    print("KERNEL_OK")
</pallas_src>

<mosaic_0001>
module attributes {stable_mosaic.version = 11 : i64} {
  func.func @patch_embed_kernel(%arg0: i32, %arg1: i32, %arg2: memref<1x4x8x8xf32, #tpu.memory_space<vmem>>, %arg3: memref<4x1x8xf32, #tpu.memory_space<vmem>>, %arg4: memref<4x1x8xf32, #tpu.memory_space<vmem>>, %arg5: memref<4x8x32xf32, #tpu.memory_space<vmem>>, %arg6: memref<1x32xf32, #tpu.memory_space<vmem>>, %arg7: memref<1x32xf32, #tpu.memory_space<vmem>>, %arg8: memref<1x32xf32, #tpu.memory_space<vmem>>, %arg9: memref<1x8x32xf32, #tpu.memory_space<vmem>>) attributes {dimension_semantics = [#tpu.dimension_semantics<parallel>, #tpu.dimension_semantics<parallel>], iteration_bounds = array<i64: 2, 1>, scalar_prefetch = 0 : i64, scratch_operands = 0 : i64, tpu.core_type = #tpu.core_type<tc>, window_params = [{transform_indices = @transform_0, window_bounds = array<i64: 1, 4, 8, 8>}, {pipeline_mode = #tpu.pipeline_mode<synchronous>, transform_indices = @transform_1, window_bounds = array<i64: 4, 1, 8>}, {pipeline_mode = #tpu.pipeline_mode<synchronous>, transform_indices = @transform_2, window_bounds = array<i64: 4, 1, 8>}, {pipeline_mode = #tpu.pipeline_mode<synchronous>, transform_indices = @transform_3, window_bounds = array<i64: 4, 8, 32>}, {pipeline_mode = #tpu.pipeline_mode<synchronous>, transform_indices = @transform_4, window_bounds = array<i64: 1, 32>}, {pipeline_mode = #tpu.pipeline_mode<synchronous>, transform_indices = @transform_5, window_bounds = array<i64: 1, 32>}, {pipeline_mode = #tpu.pipeline_mode<synchronous>, transform_indices = @transform_6, window_bounds = array<i64: 1, 32>}, {transform_indices = @transform_7, window_bounds = array<i64: 1, 8, 32>}]} {
    %cst = arith.constant 0.000000e+00 : f32
    %0 = vector.broadcast %cst : f32 to vector<8x1xf32>
    %c0 = arith.constant 0 : index
    %c0_0 = arith.constant 0 : index
    %c0_1 = arith.constant 0 : index
    %c0_2 = arith.constant 0 : index
    %1 = vector.load %arg2[%c0, %c0_0, %c0_1, %c0_2] : memref<1x4x8x8xf32, #tpu.memory_space<vmem>>, vector<1x1x8x8xf32>
    %2 = vector.shape_cast %1 : vector<1x1x8x8xf32> to vector<1x8x8xf32>
    %3 = vector.shape_cast %2 : vector<1x8x8xf32> to vector<8x8xf32>
    %cst_3 = arith.constant dense<0.000000e+00> : vector<8xf32>
    %4 = vector.multi_reduction <add>, %3, %cst_3 [1] : vector<8x8xf32> to vector<8xf32>
    %5 = vector.shape_cast %4 : vector<8xf32> to vector<8x1xf32>
    %6 = arith.addf %0, %5 : vector<8x1xf32>
    %c0_4 = arith.constant 0 : index
    %c1 = arith.constant 1 : index
    %c0_5 = arith.constant 0 : index
    %c0_6 = arith.constant 0 : index
    %7 = vector.load %arg2[%c0_4, %c1, %c0_5, %c0_6] : memref<1x4x8x8xf32, #tpu.memory_space<vmem>>, vector<1x1x8x8xf32>
    %8 = vector.shape_cast %7 : vector<1x1x8x8xf32> to vector<1x8x8xf32>
    %9 = vector.shape_cast %8 : vector<1x8x8xf32> to vector<8x8xf32>
    %cst_7 = arith.constant dense<0.000000e+00> : vector<8xf32>
    %10 = vector.multi_reduction <add>, %9, %cst_7 [1] : vector<8x8xf32> to vector<8xf32>
    %11 = vector.shape_cast %10 : vector<8xf32> to vector<8x1xf32>
    %12 = arith.addf %6, %11 : vector<8x1xf32>
    %c0_8 = arith.constant 0 : index
    %c2 = arith.constant 2 : index
    %c0_9 = arith.constant 0 : index
    %c0_10 = arith.constant 0 : index
    %13 = vector.load %arg2[%c0_8, %c2, %c0_9, %c0_10] : memref<1x4x8x8xf32, #tpu.memory_space<vmem>>, vector<1x1x8x8xf32>
    %14 = vector.shape_cast %13 : vector<1x1x8x8xf32> to vector<1x8x8xf32>
    %15 = vector.shape_cast %14 : vector<1x8x8xf32> to vector<8x8xf32>
    %cst_11 = arith.constant dense<0.000000e+00> : vector<8xf32>
    %16 = vector.multi_reduction <add>, %15, %cst_11 [1] : vector<8x8xf32> to vector<8xf32>
    %17 = vector.shape_cast %16 : vector<8xf32> to vector<8x1xf32>
    %18 = arith.addf %12, %17 : vector<8x1xf32>
    %c0_12 = arith.constant 0 : index
    %c3 = arith.constant 3 : index
    %c0_13 = arith.constant 0 : index
    %c0_14 = arith.constant 0 : index
    %19 = vector.load %arg2[%c0_12, %c3, %c0_13, %c0_14] : memref<1x4x8x8xf32, #tpu.memory_space<vmem>>, vector<1x1x8x8xf32>
    %20 = vector.shape_cast %19 : vector<1x1x8x8xf32> to vector<1x8x8xf32>
    %21 = vector.shape_cast %20 : vector<1x8x8xf32> to vector<8x8xf32>
    %cst_15 = arith.constant dense<0.000000e+00> : vector<8xf32>
    %22 = vector.multi_reduction <add>, %21, %cst_15 [1] : vector<8x8xf32> to vector<8xf32>
    %23 = vector.shape_cast %22 : vector<8xf32> to vector<8x1xf32>
    %24 = arith.addf %18, %23 : vector<8x1xf32>
    %cst_16 = arith.constant 3.125000e-02 : f32
    %25 = vector.broadcast %cst_16 : f32 to vector<8x1xf32>
    %26 = arith.mulf %24, %25 : vector<8x1xf32>
    %cst_17 = arith.constant 0.000000e+00 : f32
    %27 = vector.broadcast %cst_17 : f32 to vector<8x1xf32>
    %c0_18 = arith.constant 0 : index
    %c0_19 = arith.constant 0 : index
    %c0_20 = arith.constant 0 : index
    %c0_21 = arith.constant 0 : index
    %28 = vector.load %arg2[%c0_18, %c0_19, %c0_20, %c0_21] : memref<1x4x8x8xf32, #tpu.memory_space<vmem>>, vector<1x1x8x8xf32>
    %29 = vector.shape_cast %28 : vector<1x1x8x8xf32> to vector<1x8x8xf32>
    %30 = vector.shape_cast %29 : vector<1x8x8xf32> to vector<8x8xf32>
    %31 = vector.broadcast %26 : vector<8x1xf32> to vector<8x8xf32>
    %32 = arith.subf %30, %31 : vector<8x8xf32>
    %33 = arith.mulf %32, %32 : vector<8x8xf32>
    %cst_22 = arith.constant dense<0.000000e+00> : vector<8xf32>
    %34 = vector.multi_reduction <add>, %33, %cst_22 [1] : vector<8x8xf32> to vector<8xf32>
    %35 = vector.shape_cast %34 : vector<8xf32> to vector<8x1xf32>
    %36 = arith.addf %27, %35 : vector<8x1xf32>
    %c0_23 = arith.constant 0 : index
    %c1_24 = arith.constant 1 : index
    %c0_25 = arith.constant 0 : index
    %c0_26 = arith.constant 0 : index
    %37 = vector.load %arg2[%c0_23, %c1_24, %c0_25, %c0_26] : memref<1x4x8x8xf32, #tpu.memory_space<vmem>>, vector<1x1x8x8xf32>
    %38 = vector.shape_cast %37 : vector<1x1x8x8xf32> to vector<1x8x8xf32>
    %39 = vector.shape_cast %38 : vector<1x8x8xf32> to vector<8x8xf32>
    %40 = vector.broadcast %26 : vector<8x1xf32> to vector<8x8xf32>
    %41 = arith.subf %39, %40 : vector<8x8xf32>
    %42 = arith.mulf %41, %41 : vector<8x8xf32>
    %cst_27 = arith.constant dense<0.000000e+00> : vector<8xf32>
    %43 = vector.multi_reduction <add>, %42, %cst_27 [1] : vector<8x8xf32> to vector<8xf32>
    %44 = vector.shape_cast %43 : vector<8xf32> to vector<8x1xf32>
    %45 = arith.addf %36, %44 : vector<8x1xf32>
    %c0_28 = arith.constant 0 : index
    %c2_29 = arith.constant 2 : index
    %c0_30 = arith.constant 0 : index
    %c0_31 = arith.constant 0 : index
    %46 = vector.load %arg2[%c0_28, %c2_29, %c0_30, %c0_31] : memref<1x4x8x8xf32, #tpu.memory_space<vmem>>, vector<1x1x8x8xf32>
    %47 = vector.shape_cast %46 : vector<1x1x8x8xf32> to vector<1x8x8xf32>
    %48 = vector.shape_cast %47 : vector<1x8x8xf32> to vector<8x8xf32>
    %49 = vector.broadcast %26 : vector<8x1xf32> to vector<8x8xf32>
    %50 = arith.subf %48, %49 : vector<8x8xf32>
    %51 = arith.mulf %50, %50 : vector<8x8xf32>
    %cst_32 = arith.constant dense<0.000000e+00> : vector<8xf32>
    %52 = vector.multi_reduction <add>, %51, %cst_32 [1] : vector<8x8xf32> to vector<8xf32>
    %53 = vector.shape_cast %52 : vector<8xf32> to vector<8x1xf32>
    %54 = arith.addf %45, %53 : vector<8x1xf32>
    %c0_33 = arith.constant 0 : index
    %c3_34 = arith.constant 3 : index
    %c0_35 = arith.constant 0 : index
    %c0_36 = arith.constant 0 : index
    %55 = vector.load %arg2[%c0_33, %c3_34, %c0_35, %c0_36] : memref<1x4x8x8xf32, #tpu.memory_space<vmem>>, vector<1x1x8x8xf32>
    %56 = vector.shape_cast %55 : vector<1x1x8x8xf32> to vector<1x8x8xf32>
    %57 = vector.shape_cast %56 : vector<1x8x8xf32> to vector<8x8xf32>
    %58 = vector.broadcast %26 : vector<8x1xf32> to vector<8x8xf32>
    %59 = arith.subf %57, %58 : vector<8x8xf32>
    %60 = arith.mulf %59, %59 : vector<8x8xf32>
    %cst_37 = arith.constant dense<0.000000e+00> : vector<8xf32>
    %61 = vector.multi_reduction <add>, %60, %cst_37 [1] : vector<8x8xf32> to vector<8xf32>
    %62 = vector.shape_cast %61 : vector<8xf32> to vector<8x1xf32>
    %63 = arith.addf %54, %62 : vector<8x1xf32>
    %cst_38 = arith.constant 3.125000e-02 : f32
    %64 = vector.broadcast %cst_38 : f32 to vector<8x1xf32>
    %65 = arith.mulf %63, %64 : vector<8x1xf32>
    %cst_39 = arith.constant 9.99999974E-6 : f32
    %66 = vector.broadcast %cst_39 : f32 to vector<8x1xf32>
    %67 = arith.addf %65, %66 : vector<8x1xf32>
    %68 = math.rsqrt %67 : vector<8x1xf32>
    %cst_40 = arith.constant 0.000000e+00 : f32
    %69 = vector.broadcast %cst_40 : f32 to vector<8x32xf32>
    %c0_41 = arith.constant 0 : index
    %c0_42 = arith.constant 0 : index
    %c0_43 = arith.constant 0 : index
    %c0_44 = arith.constant 0 : index
    %70 = vector.load %arg2[%c0_41, %c0_42, %c0_43, %c0_44] : memref<1x4x8x8xf32, #tpu.memory_space<vmem>>, vector<1x1x8x8xf32>
    %71 = vector.shape_cast %70 : vector<1x1x8x8xf32> to vector<1x8x8xf32>
    %72 = vector.shape_cast %71 : vector<1x8x8xf32> to vector<8x8xf32>
    %73 = vector.broadcast %26 : vector<8x1xf32> to vector<8x8xf32>
    %74 = arith.subf %72, %73 : vector<8x8xf32>
    %75 = vector.broadcast %68 : vector<8x1xf32> to vector<8x8xf32>
    %76 = arith.mulf %74, %75 : vector<8x8xf32>
    %c0_45 = arith.constant 0 : index
    %c0_46 = arith.constant 0 : index
    %c0_47 = arith.constant 0 : index
    %77 = vector.load %arg3[%c0_45, %c0_46, %c0_47] : memref<4x1x8xf32, #tpu.memory_space<vmem>>, vector<1x1x8xf32>
    %78 = vector.shape_cast %77 : vector<1x1x8xf32> to vector<1x8xf32>
    %79 = vector.broadcast %78 : vector<1x8xf32> to vector<8x8xf32>
    %80 = arith.mulf %76, %79 : vector<8x8xf32>
    %c0_48 = arith.constant 0 : index
    %c0_49 = arith.constant 0 : index
    %c0_50 = arith.constant 0 : index
    %81 = vector.load %arg4[%c0_48, %c0_49, %c0_50] : memref<4x1x8xf32, #tpu.memory_space<vmem>>, vector<1x1x8xf32>
    %82 = vector.shape_cast %81 : vector<1x1x8xf32> to vector<1x8xf32>
    %83 = vector.broadcast %82 : vector<1x8xf32> to vector<8x8xf32>
    %84 = arith.addf %80, %83 : vector<8x8xf32>
    %c0_51 = arith.constant 0 : index
    %c0_52 = arith.constant 0 : index
    %c0_53 = arith.constant 0 : index
    %85 = vector.load %arg5[%c0_51, %c0_52, %c0_53] : memref<4x8x32xf32, #tpu.memory_space<vmem>>, vector<1x8x32xf32>
    %86 = vector.shape_cast %85 : vector<1x8x32xf32> to vector<8x32xf32>
    %cst_54 = arith.constant dense<0.000000e+00> : vector<8x32xf32>
    %87 = tpu.matmul %84, %86, %cst_54 {dimension_numbers = #tpu.dot_dimension_numbers<[1], [0], [0], [1], [0, 0, 1, 1], [], []>} : vector<8x8xf32>, vector<8x32xf32>, vector<8x32xf32> -> vector<8x32xf32>
    %88 = arith.addf %69, %87 : vector<8x32xf32>
    %c0_55 = arith.constant 0 : index
    %c1_56 = arith.constant 1 : index
    %c0_57 = arith.constant 0 : index
    %c0_58 = arith.constant 0 : index
    %89 = vector.load %arg2[%c0_55, %c1_56, %c0_57, %c0_58] : memref<1x4x8x8xf32, #tpu.memory_space<vmem>>, vector<1x1x8x8xf32>
    %90 = vector.shape_cast %89 : vector<1x1x8x8xf32> to vector<1x8x8xf32>
    %91 = vector.shape_cast %90 : vector<1x8x8xf32> to vector<8x8xf32>
    %92 = vector.broadcast %26 : vector<8x1xf32> to vector<8x8xf32>
    %93 = arith.subf %91, %92 : vector<8x8xf32>
    %94 = vector.broadcast %68 : vector<8x1xf32> to vector<8x8xf32>
    %95 = arith.mulf %93, %94 : vector<8x8xf32>
    %c1_59 = arith.constant 1 : index
    %c0_60 = arith.constant 0 : index
    %c0_61 = arith.constant 0 : index
    %96 = vector.load %arg3[%c1_59, %c0_60, %c0_61] : memref<4x1x8xf32, #tpu.memory_space<vmem>>, vector<1x1x8xf32>
    %97 = vector.shape_cast %96 : vector<1x1x8xf32> to vector<1x8xf32>
    %98 = vector.broadcast %97 : vector<1x8xf32> to vector<8x8xf32>
    %99 = arith.mulf %95, %98 : vector<8x8xf32>
    %c1_62 = arith.constant 1 : index
    %c0_63 = arith.constant 0 : index
    %c0_64 = arith.constant 0 : index
    %100 = vector.load %arg4[%c1_62, %c0_63, %c0_64] : memref<4x1x8xf32, #tpu.memory_space<vmem>>, vector<1x1x8xf32>
    %101 = vector.shape_cast %100 : vector<1x1x8xf32> to vector<1x8xf32>
    %102 = vector.broadcast %101 : vector<1x8xf32> to vector<8x8xf32>
    %103 = arith.addf %99, %102 : vector<8x8xf32>
    %c1_65 = arith.constant 1 : index
    %c0_66 = arith.constant 0 : index
    %c0_67 = arith.constant 0 : index
    %104 = vector.load %arg5[%c1_65, %c0_66, %c0_67] : memref<4x8x32xf32, #tpu.memory_space<vmem>>, vector<1x8x32xf32>
    %105 = vector.shape_cast %104 : vector<1x8x32xf32> to vector<8x32xf32>
    %cst_68 = arith.constant dense<0.000000e+00> : vector<8x32xf32>
    %106 = tpu.matmul %103, %105, %cst_68 {dimension_numbers = #tpu.dot_dimension_numbers<[1], [0], [0], [1], [0, 0, 1, 1], [], []>} : vector<8x8xf32>, vector<8x32xf32>, vector<8x32xf32> -> vector<8x32xf32>
    %107 = arith.addf %88, %106 : vector<8x32xf32>
    %c0_69 = arith.constant 0 : index
    %c2_70 = arith.constant 2 : index
    %c0_71 = arith.constant 0 : index
    %c0_72 = arith.constant 0 : index
    %108 = vector.load %arg2[%c0_69, %c2_70, %c0_71, %c0_72] : memref<1x4x8x8xf32, #tpu.memory_space<vmem>>, vector<1x1x8x8xf32>
    %109 = vector.shape_cast %108 : vector<1x1x8x8xf32> to vector<1x8x8xf32>
    %110 = vector.shape_cast %109 : vector<1x8x8xf32> to vector<8x8xf32>
    %111 = vector.broadcast %26 : vector<8x1xf32> to vector<8x8xf32>
    %112 = arith.subf %110, %111 : vector<8x8xf32>
    %113 = vector.broadcast %68 : vector<8x1xf32> to vector<8x8xf32>
    %114 = arith.mulf %112, %113 : vector<8x8xf32>
    %c2_73 = arith.constant 2 : index
    %c0_74 = arith.constant 0 : index
    %c0_75 = arith.constant 0 : index
    %115 = vector.load %arg3[%c2_73, %c0_74, %c0_75] : memref<4x1x8xf32, #tpu.memory_space<vmem>>, vector<1x1x8xf32>
    %116 = vector.shape_cast %115 : vector<1x1x8xf32> to vector<1x8xf32>
    %117 = vector.broadcast %116 : vector<1x8xf32> to vector<8x8xf32>
    %118 = arith.mulf %114, %117 : vector<8x8xf32>
    %c2_76 = arith.constant 2 : index
    %c0_77 = arith.constant 0 : index
    %c0_78 = arith.constant 0 : index
    %119 = vector.load %arg4[%c2_76, %c0_77, %c0_78] : memref<4x1x8xf32, #tpu.memory_space<vmem>>, vector<1x1x8xf32>
    %120 = vector.shape_cast %119 : vector<1x1x8xf32> to vector<1x8xf32>
    %121 = vector.broadcast %120 : vector<1x8xf32> to vector<8x8xf32>
    %122 = arith.addf %118, %121 : vector<8x8xf32>
    %c2_79 = arith.constant 2 : index
    %c0_80 = arith.constant 0 : index
    %c0_81 = arith.constant 0 : index
    %123 = vector.load %arg5[%c2_79, %c0_80, %c0_81] : memref<4x8x32xf32, #tpu.memory_space<vmem>>, vector<1x8x32xf32>
    %124 = vector.shape_cast %123 : vector<1x8x32xf32> to vector<8x32xf32>
    %cst_82 = arith.constant dense<0.000000e+00> : vector<8x32xf32>
    %125 = tpu.matmul %122, %124, %cst_82 {dimension_numbers = #tpu.dot_dimension_numbers<[1], [0], [0], [1], [0, 0, 1, 1], [], []>} : vector<8x8xf32>, vector<8x32xf32>, vector<8x32xf32> -> vector<8x32xf32>
    %126 = arith.addf %107, %125 : vector<8x32xf32>
    %c0_83 = arith.constant 0 : index
    %c3_84 = arith.constant 3 : index
    %c0_85 = arith.constant 0 : index
    %c0_86 = arith.constant 0 : index
    %127 = vector.load %arg2[%c0_83, %c3_84, %c0_85, %c0_86] : memref<1x4x8x8xf32, #tpu.memory_space<vmem>>, vector<1x1x8x8xf32>
    %128 = vector.shape_cast %127 : vector<1x1x8x8xf32> to vector<1x8x8xf32>
    %129 = vector.shape_cast %128 : vector<1x8x8xf32> to vector<8x8xf32>
    %130 = vector.broadcast %26 : vector<8x1xf32> to vector<8x8xf32>
    %131 = arith.subf %129, %130 : vector<8x8xf32>
    %132 = vector.broadcast %68 : vector<8x1xf32> to vector<8x8xf32>
    %133 = arith.mulf %131, %132 : vector<8x8xf32>
    %c3_87 = arith.constant 3 : index
    %c0_88 = arith.constant 0 : index
    %c0_89 = arith.constant 0 : index
    %134 = vector.load %arg3[%c3_87, %c0_88, %c0_89] : memref<4x1x8xf32, #tpu.memory_space<vmem>>, vector<1x1x8xf32>
    %135 = vector.shape_cast %134 : vector<1x1x8xf32> to vector<1x8xf32>
    %136 = vector.broadcast %135 : vector<1x8xf32> to vector<8x8xf32>
    %137 = arith.mulf %133, %136 : vector<8x8xf32>
    %c3_90 = arith.constant 3 : index
    %c0_91 = arith.constant 0 : index
    %c0_92 = arith.constant 0 : index
    %138 = vector.load %arg4[%c3_90, %c0_91, %c0_92] : memref<4x1x8xf32, #tpu.memory_space<vmem>>, vector<1x1x8xf32>
    %139 = vector.shape_cast %138 : vector<1x1x8xf32> to vector<1x8xf32>
    %140 = vector.broadcast %139 : vector<1x8xf32> to vector<8x8xf32>
    %141 = arith.addf %137, %140 : vector<8x8xf32>
    %c3_93 = arith.constant 3 : index
    %c0_94 = arith.constant 0 : index
    %c0_95 = arith.constant 0 : index
    %142 = vector.load %arg5[%c3_93, %c0_94, %c0_95] : memref<4x8x32xf32, #tpu.memory_space<vmem>>, vector<1x8x32xf32>
    %143 = vector.shape_cast %142 : vector<1x8x32xf32> to vector<8x32xf32>
    %cst_96 = arith.constant dense<0.000000e+00> : vector<8x32xf32>
    %144 = tpu.matmul %141, %143, %cst_96 {dimension_numbers = #tpu.dot_dimension_numbers<[1], [0], [0], [1], [0, 0, 1, 1], [], []>} : vector<8x8xf32>, vector<8x32xf32>, vector<8x32xf32> -> vector<8x32xf32>
    %145 = arith.addf %126, %144 : vector<8x32xf32>
    %c0_97 = arith.constant 0 : index
    %c0_98 = arith.constant 0 : index
    %146 = vector.load %arg6[%c0_97, %c0_98] : memref<1x32xf32, #tpu.memory_space<vmem>>, vector<1x32xf32>
    %147 = vector.broadcast %146 : vector<1x32xf32> to vector<8x32xf32>
    %148 = arith.addf %145, %147 : vector<8x32xf32>
    %cst_99 = arith.constant dense<0.000000e+00> : vector<8xf32>
    %149 = vector.multi_reduction <add>, %148, %cst_99 [1] : vector<8x32xf32> to vector<8xf32>
    %150 = vector.shape_cast %149 : vector<8xf32> to vector<8x1xf32>
    %cst_100 = arith.constant 3.200000e+01 : f32
    %151 = vector.broadcast %cst_100 : f32 to vector<8x1xf32>
    %152 = arith.divf %150, %151 : vector<8x1xf32>
    %153 = vector.broadcast %152 : vector<8x1xf32> to vector<8x32xf32>
    %154 = arith.subf %148, %153 : vector<8x32xf32>
    %155 = arith.mulf %154, %154 : vector<8x32xf32>
    %cst_101 = arith.constant dense<0.000000e+00> : vector<8xf32>
    %156 = vector.multi_reduction <add>, %155, %cst_101 [1] : vector<8x32xf32> to vector<8xf32>
    %157 = vector.shape_cast %156 : vector<8xf32> to vector<8x1xf32>
    %cst_102 = arith.constant 3.200000e+01 : f32
    %158 = vector.broadcast %cst_102 : f32 to vector<8x1xf32>
    %159 = arith.divf %157, %158 : vector<8x1xf32>
    %160 = vector.broadcast %152 : vector<8x1xf32> to vector<8x32xf32>
    %161 = arith.subf %148, %160 : vector<8x32xf32>
    %cst_103 = arith.constant 9.99999974E-6 : f32
    %162 = vector.broadcast %cst_103 : f32 to vector<8x1xf32>
    %163 = arith.addf %159, %162 : vector<8x1xf32>
    %164 = math.rsqrt %163 : vector<8x1xf32>
    %165 = vector.broadcast %164 : vector<8x1xf32> to vector<8x32xf32>
    %166 = arith.mulf %161, %165 : vector<8x32xf32>
    %c0_104 = arith.constant 0 : index
    %c0_105 = arith.constant 0 : index
    %167 = vector.load %arg7[%c0_104, %c0_105] : memref<1x32xf32, #tpu.memory_space<vmem>>, vector<1x32xf32>
    %168 = vector.broadcast %167 : vector<1x32xf32> to vector<8x32xf32>
    %169 = arith.mulf %166, %168 : vector<8x32xf32>
    %c0_106 = arith.constant 0 : index
    %c0_107 = arith.constant 0 : index
    %170 = vector.load %arg8[%c0_106, %c0_107] : memref<1x32xf32, #tpu.memory_space<vmem>>, vector<1x32xf32>
    %171 = vector.broadcast %170 : vector<1x32xf32> to vector<8x32xf32>
    %172 = arith.addf %169, %171 : vector<8x32xf32>
    %173 = vector.shape_cast %172 : vector<8x32xf32> to vector<1x8x32xf32>
    %c0_108 = arith.constant 0 : index
    %c0_109 = arith.constant 0 : index
    %c0_110 = arith.constant 0 : index
    %174 = vector.load %arg9[%c0_108, %c0_109, %c0_110] : memref<1x8x32xf32, #tpu.memory_space<vmem>>, vector<1x8x32xf32>
    tpu.vector_store %arg9[%c0_108, %c0_109, %c0_110], %173 {strides = array<i32>} : memref<1x8x32xf32, #tpu.memory_space<vmem>>, vector<1x8x32xf32>,
    return
  }
  func.func @transform_0(%arg0: i32, %arg1: i32) -> (i32, i32, i32, i32) {
    %c0_i32 = arith.constant 0 : i32
    %c0_i32_0 = arith.constant 0 : i32
    %c0_i32_1 = arith.constant 0 : i32
    return %arg0, %c0_i32, %arg1, %c0_i32_0 : i32, i32, i32, i32
  }
  func.func @transform_1(%arg0: i32, %arg1: i32) -> (i32, i32, i32) {
    %c0_i32 = arith.constant 0 : i32
    %c0_i32_0 = arith.constant 0 : i32
    %c0_i32_1 = arith.constant 0 : i32
    %c0_i32_2 = arith.constant 0 : i32
    return %c0_i32, %c0_i32_0, %c0_i32_1 : i32, i32, i32
  }
  func.func @transform_2(%arg0: i32, %arg1: i32) -> (i32, i32, i32) {
    %c0_i32 = arith.constant 0 : i32
    %c0_i32_0 = arith.constant 0 : i32
    %c0_i32_1 = arith.constant 0 : i32
    %c0_i32_2 = arith.constant 0 : i32
    return %c0_i32, %c0_i32_0, %c0_i32_1 : i32, i32, i32
  }
  func.func @transform_3(%arg0: i32, %arg1: i32) -> (i32, i32, i32) {
    %c0_i32 = arith.constant 0 : i32
    %c0_i32_0 = arith.constant 0 : i32
    %c0_i32_1 = arith.constant 0 : i32
    %c0_i32_2 = arith.constant 0 : i32
    return %c0_i32, %c0_i32_0, %c0_i32_1 : i32, i32, i32
  }
  func.func @transform_4(%arg0: i32, %arg1: i32) -> (i32, i32) {
    %c0_i32 = arith.constant 0 : i32
    %c0_i32_0 = arith.constant 0 : i32
    %c0_i32_1 = arith.constant 0 : i32
    return %c0_i32, %c0_i32_0 : i32, i32
  }
  func.func @transform_5(%arg0: i32, %arg1: i32) -> (i32, i32) {
    %c0_i32 = arith.constant 0 : i32
    %c0_i32_0 = arith.constant 0 : i32
    %c0_i32_1 = arith.constant 0 : i32
    return %c0_i32, %c0_i32_0 : i32, i32
  }
  func.func @transform_6(%arg0: i32, %arg1: i32) -> (i32, i32) {
    %c0_i32 = arith.constant 0 : i32
    %c0_i32_0 = arith.constant 0 : i32
    %c0_i32_1 = arith.constant 0 : i32
    return %c0_i32, %c0_i32_0 : i32, i32
  }
  func.func @transform_7(%arg0: i32, %arg1: i32) -> (i32, i32, i32) {
    %c0_i32 = arith.constant 0 : i32
    %c0_i32_0 = arith.constant 0 : i32
    return %arg0, %arg1, %c0_i32 : i32, i32, i32
  }
}

</mosaic_0001>

<bundles_post_ra>
// kernel: tpu_custom_call.1
= control target key start
LH: loop header
LB: loop body
LE: loop exit
PB: predicated region body
PF: predicated region fallthrough
CT: control target
= control target key end

     0   :  { %s1588_s0 = inlined_call_operand.hbm [shape: f32[2,4,8,8], index: 0, kind: input, shape index: {}]   ;;  %s1589_s1 = inlined_call_operand.hbm [shape: f32[4,1,8], index: 1, kind: input, shape index: {}]   ;;  %s1590_s2 = inlined_call_operand.hbm [shape: f32[4,1,8], index: 2, kind: input, shape index: {}]   ;;  %s1591_s3 = inlined_call_operand.hbm [shape: f32[4,8,32], index: 3, kind: input, shape index: {}]   ;;  %s1592_s4 = inlined_call_operand.vmem [shape: f32[1,32], index: 4, kind: input, shape index: {}]   ;;  %s1593_s5 = inlined_call_operand.vmem [shape: f32[1,32], index: 5, kind: input, shape index: {}]   ;;  %s1594_s6 = inlined_call_operand.vmem [shape: f32[1,32], index: 6, kind: input, shape index: {}]   ;;  %s1595_s7 = inlined_call_operand.hbm [shape: f32[2,8,32], index: 7, kind: output, shape index: {}]  }
   0x1   :  { %1602 = sst [smem:[#allocation15_spill]] %s1589_s1 }
   0x2   :  { %1603 = sst [smem:[#allocation16_spill]] %s1590_s2 }
   0x3   :  { %1604 = sst [smem:[#allocation17_spill]] %s1591_s3 }
   0x4   :  { %12 = vsyncpa [#allocation3], 0 }
   0x5   :  { %14 = vsyncpa [#allocation3 + $0x1], 0 }
   0x6   :  { %15 = vsyncpa [#allocation6], 0 }
   0x7   :  { %16 = vsyncpa [#allocation9], 0 }
   0x8   :  { %17 = vsyncpa [#allocation4], 0 }
   0x9   :  { %19 = vsyncpa [#allocation4 + $0x1], 0  ;;  %s1367_s24 = smov 0   ;;  %s1369_s25 = smov 0  }
   0xa   :  { %s1371_s26 = smov 0   ;;  %s1373_s27 = smov 0  }
   0xb   :  { %s1375_s28 = smov 0   ;;  %s1377_s29 = smov 0  }
   0xc LB: > { %s950_s30 = sadd.s32 4294967295, %s1314_s29   ;;  %s951_s8 = sadd.s32 4294967294, %s1314_s29   ;;  %s1314_s29 = sphi %s1377_s29, %s25_s29   ;;  %s1310_s28 = sphi %s1375_s28, %s1627_s28   ;;  %s1306_s27 = sphi %s1373_s27, %s1626_s27   ;;  %s1302_s26 = sphi %s1371_s26, %s1625_s26   ;;  %s1298_s25 = sphi %s1369_s25, %s1624_s25   ;;  %s1294_s24 = sphi %s1367_s24, %s1623_s24  }
   0xd   : > { %p59_p0 = scmp.ne.s32.totalorder %s1298_s25, %s1294_s24  ;;  %p1401_p1 = scmp.eq.s32.totalorder %s950_s30, 0 }
   0xe   : > { %p1405_p2 = scmp.eq.s32.totalorder %s950_s30, 1  ;;  %p217_p3 = scmp.eq.s32.totalorder %s951_s8, 1 }
   0xf   : > { %s1605_s9 = scalar_select %p1401_p1, 1, 0 }
  0x10   : > { %p1411_p4 = por %p1401_p1, %p59_p0  ;;  %p952_p5 = scmp.ge.s32.totalorder %s1314_s29, 1 }
  0x11   : > { %p1416_p6 = por %p217_p3, %p59_p0  ;;  %p224_p7 = scmp.lt.s32.totalorder %s1314_s29, 3 }
  0x12   : > { %s1607_s11 = scalar_select %p1411_p4, 1, 0 }
  0x13   : > { %s1608_s12 = scalar_select %p1416_p6, 1, 0 }
  0x14   : > { %p1421_p8 = pnand %p952_p5, %p224_p7  ;;  %s1316_s14 = smov [#allocation5]  }
  0x15   : > { %s236_s15 = sshll.u32 %s1316_s14, 4  ;;  %s1317_s17 = smov [#allocation7]   ;;  %s237_s15 = int_to_ptr.vmem [resolvable:$true] %s236_s15 }
  0x16   : > { %s1609_s13 = scalar_select %p1421_p8, 1, 0 }
  0x17   : > { %p1033_p9 = pneg %p1421_p8  ;;  %s249_s18 = sshll.u32 %s1317_s17, 4  ;;  %s250_s18 = int_to_ptr.vmem [resolvable:$true] %s249_s18 }
  0x18   : > { %s1318_s19 = smov [#allocation8]   ;;  %s1131_s21 = scalar_lea.vmem %s237_s15, 64 }
  0x19   : > { %p1430_p11 = pnand %p1033_p9, %p1401_p1  ;;  %s262_s20 = sshll.u32 %s1318_s19, 4  ;;  %s263_s20 = int_to_ptr.vmem [resolvable:$true] %s262_s20 }
  0x1a   : > { %p1132_p13 = scmp.ne.s32.totalorder %s237_s15, %s1131_s21  ;;  %p1139_p5 = scmp.lt.s32.totalorder %s237_s15, %s237_s15 }
  0x1b   : > { %p1122_p12 = pneg %p1430_p11  ;;  %p1140_p7 = scmp.lt.s32.totalorder %s1131_s21, %s1131_s21 }
  0x1d   : > { %p1134_p0 = pnand %p1132_p13, %p1122_p12  ;;  %p1141_p9 = por %p1140_p7, %p1139_p5 }
  0x1f   : > { %p1135_p3 = pneg %p1134_p0 }
  0x21   : > { %p1142_p10 = pnand %p1141_p9, %p1135_p3 }
  0x23   : > { %1145 = shalt.err (!%p1142_p10)
}
  0x24   : > { %s1319_s22 = smov 16   ;;  %s1320_s23 = smov 1  }
  0x25   : > { %s1611_s1 = sld [smem:[#allocation15_spill]]  ;;  %s1157_s14 = scalar_lea.vmem %s250_s18, 64 }
  0x26   : > { %p1158_p6 = scmp.ne.s32.totalorder %s250_s18, %s1157_s14  ;;  %p1165_p1 = scmp.lt.s32.totalorder %s250_s18, %s250_s18 }
  0x27   : > { %p1166_p4 = scmp.lt.s32.totalorder %s1157_s14, %s1157_s14 }
  0x28   : > { %p1160_p13 = pnand %p1158_p6, %p1122_p12 }
  0x29   : > { %p1167_p5 = por %p1166_p4, %p1165_p1 }
  0x2a   : > { %p1161_p0 = pneg %p1160_p13 }
  0x2b   : > { %1036 = dma.hbm_to_vmem [thread:$0]  (!%p1430_p11), %s1611_s1, 64, %s237_s15, [#allocation6], %s1319_s22, %s1319_s22, %s1320_s23  }
  0x2c   : > { %p1168_p3 = pnand %p1167_p5, %p1161_p0 }
  0x2e   : > { %1171 = shalt.err (!%p1168_p3)
}
  0x2f   : > { %s1612_s2 = sld [smem:[#allocation16_spill]]  ;;  %s1183_s15 = scalar_lea.vmem %s263_s20, 512 }
  0x30   : > { %p1184_p10 = scmp.ne.s32.totalorder %s263_s20, %s1183_s15  ;;  %p1191_p9 = scmp.lt.s32.totalorder %s263_s20, %s263_s20 }
  0x31   : > { %p1192_p13 = scmp.lt.s32.totalorder %s1183_s15, %s1183_s15 }
  0x32   : > { %p1186_p7 = pnand %p1184_p10, %p1122_p12 }
  0x33   : > { %p1193_p8 = por %p1192_p13, %p1191_p9 }
  0x34   : > { %p1187_p6 = pneg %p1186_p7 }
  0x35   : > { %1039 = dma.hbm_to_vmem [thread:$0]  (!%p1430_p11), %s1612_s2, 64, %s250_s18, [#allocation6], %s1319_s22, %s1319_s22, %s1320_s23  }
  0x36   : > { %p1194_p1 = pnand %p1193_p8, %p1187_p6 }
  0x38   : > { %1197 = shalt.err (!%p1194_p1)
}
  0x39   : > { %s1600_s21 = smov 128   ;;  %s1601_s18 = smov 8  }
  0x3a   : > { %s1613_s3 = sld [smem:[#allocation17_spill]]  ;;  %s46_s30 = sadd.s32 1, %s1302_s26 }
  0x3b   : > { %s37_s8 = sadd.s32 1, %s1310_s28  ;;  %p53_p4 = scmp.ne.s32.totalorder %s1302_s26, %s1298_s25 }
  0x3c   : > { %p39_p8 = scmp.ge.s32.totalorder %s37_s8, 2  ;;  %p54_p12 = scmp.eq.s32.totalorder %s1314_s29, 0 }
  0x3d   : > { %p1470_p0 = por %p1405_p2, %p53_p4  ;;  %p1054_p5 = scmp.lt.s32.totalorder %s1314_s29, 2 }
  0x3e   : > { %s1629_s8 = smov (%p39_p8, %s37_s8), 0  ;;  %p55_p3 = por %p54_p12, %p53_p4 }
  0x3f   : > { %s285_s16 = sand.u32 1, %s1302_s26   ;;  %s41_s17 = ssub.s32 %s1310_s28, %s1629_s8 }
  0x40   : > { %1042 = dma.hbm_to_vmem [thread:$0]  (!%p1430_p11), %s1613_s3, 512, %s263_s20, [#allocation9], %s1600_s21, %s1600_s21, %s1601_s18  }
  0x41   : > { %p44_p10 = scmp.eq.s32.totalorder %s41_s17, 0  ;;  %s957_s20 = sshll.u32 %s285_s16, 5 }
  0x42   : > { %s988_s19 = sshll.u32 %s1310_s28, 9  ;;  %s289_s21 = scalar_lea.vmem [#allocation2], %s957_s20 }
  0x43   : > { %s1482_s15 = scalar_select %p44_p10, %s1302_s26, %s46_s30  }
  0x44   : > { %s296_s10 = scalar_lea.hbm %s1588_s0, %s988_s19  ;;  %s297_s18 = sshll.u32 %s289_s21, 4  ;;  %s298_s18 = int_to_ptr.vmem [resolvable:$true] %s297_s18 }
  0x45   : > { %p1489_p2 = pnand %p1054_p5, %p55_p3  ;;  %s286_s2 = scalar_lea.sflag [#allocation3], %s285_s16 }
  0x46   : > { %s1211_s17 = scalar_lea.vmem %s298_s18, 512  ;;  %s1323_s30 = smov [#allocation2]  }
  0x47   : > { %p1200_p11 = pneg %p1489_p2  ;;  %p1212_p7 = scmp.ne.s32.totalorder %s298_s18, %s1211_s17 }
  0x48   : > { %s1216_s3 = sshll.u32 %s1323_s30, 4  ;;  %s1217_s3 = int_to_ptr.vmem [resolvable:$false] %s1216_s3 }
  0x49   : > { %p1214_p6 = pnand %p1212_p7, %p1200_p11  ;;  %s1218_s19 = scalar_lea.vmem %s1217_s3, 1024 }
  0x4a   : > { %p1219_p13 = scmp.lt.s32.totalorder %s298_s18, %s1217_s3  ;;  %p1220_p1 = scmp.lt.s32.totalorder %s1218_s19, %s1211_s17 }
  0x4b   : > { %p1215_p9 = pneg %p1214_p6 }
  0x4c   : > { %p1221_p4 = por %p1220_p1, %p1219_p13 }
  0x4e   : > { %p1222_p8 = pnand %p1221_p4, %p1215_p9 }
  0x50   : > { %1225 = shalt.err (!%p1222_p8)
}
  0x51   : > { %s1616_s21 = smov 8   ;;  %s1617_s20 = smov 128  }
  0x52   : > { %1046 = dma.hbm_to_vmem [thread:$0]  (!%p1489_p2), %s296_s10, 512, %s298_s18, %s286_s2, %s1617_s20, %s1617_s20, %s1616_s21  }
  0x53   : > { %p1618_p12 = scmp.ne.s32.totalorder %s1609_s13, 0 }
  0x54   : > { %s1503_s16 = sand.u32 (!%p1618_p12), 1, %s1298_s25   ;;  %p1619_p5 = scmp.ne.s32.totalorder (!%p1618_p12), %s1607_s11, 0 }
  0x55   : > { %309 = sbr.rel (%p1618_p12) target bundleno = 947 (0x3b3), region = 48  ;;  %s961_s3 = sshll.u32 (!%p1618_p12), %s1503_s16, 5 }
  0x56   : > { %s312_s22 = scalar_lea.sflag (!%p1618_p12), [#allocation3], %s1503_s16  ;;  %s315_s23 = scalar_lea.vmem (!%p1618_p12), [#allocation2], %s961_s3 }
  0x5a   : > { %1277 = dma.done.wait (%p1619_p5), %s312_s22, 512  }
  0x5b   : > { %1279 = vsyncadd (%p1619_p5), %s312_s22, 4294966784  ;;  %p1620_p3 = scmp.ne.s32.totalorder %s1605_s9, 0 }
  0x5d   : > { %1281 = dma.done.wait (%p1620_p3), [#allocation6], 128  }
  0x5e   : > { %1283 = vsyncadd (%p1620_p3), [#allocation6], 4294967168 }
  0x5f   : > { %1285 = dma.done.wait (%p1620_p3), [#allocation9], 512  }
  0x60   : > { %1287 = vsyncadd (%p1620_p3), [#allocation9], 4294966784  ;;  %vm359_vm0 = vcmask 64512   ;;  %v358_v0 = vld [vmem:[%s315_s23] sm:$0xff]  ;;  %v967_v1 = vld [vmem:[%s315_s23 + $0x10] sm:$0xff]  ;;  %v1324_v30 = vmov 0.0  }
  0x61   : > { %v966_v2 = vld [vmem:[%s315_s23 + $0x8] sm:$0xff]  ;;  %v360_v3 = vsel %vm359_vm0, %v358_v0, 0.0  ;;  %v372_v4 = vsel %vm359_vm0, %v967_v1, 0.0  ;;  %v968_v5 = vld [vmem:[%s315_s23 + $0x18] sm:$0xff]  ;;  %v448_v28 = vld [vmem:[#allocation8 + $0x8] sm:$0xff]  ;;  %997 = vmatprep.subr.mxu0 %v1324_v30  ;;  %1002 = vmatprep.subr.mxu1 %v1324_v30  ;;  %vm1325_vm1 = vmmov 0  }
  0x62   : > { %361 = vadd.xlane.f32.xlu0 %v360_v3  ;;  %373 = vadd.xlane.f32.xlu1 %v372_v4  ;;  %v366_v6 = vsel %vm359_vm0, %v966_v2, 0.0  ;;  %v378_v7 = vsel %vm359_vm0, %v968_v5, 0.0  ;;  %v427_v29 = vld [vmem:[#allocation8] sm:$0xff]  ;;  %v971_v41 = vld [vmem:[#allocation5 + $0x1] ss:$0 sm:$0xff]  ;;  %v615_v55 = vld [vmem:[#allocation8 + $0x10] sm:$0xff] }
  0x63   : > { %998 = vmatpush3.msra.mxu0 %v448_v28  ;;  %999 = vmatprep.mubr.msk.f32.mxu0 %vm1325_vm1, %v1324_v30  ;;  %v969_v42 = vld [vmem:[#allocation5] ss:$0 sm:$0xff]  ;;  %v975_v46 = vld [vmem:[#allocation5 + $0x2] ss:$0 sm:$0xff]  ;;  %v972_v48 = vld [vmem:[#allocation7 + $0x1] ss:$0 sm:$0xff] }
  0x64   : > { %1003 = vmatpush3.msra.mxu1 %v427_v29  ;;  %1004 = vmatprep.mubr.msk.f32.mxu1 %vm1325_vm1, %v1324_v30  ;;  %v970_v49 = vld [vmem:[#allocation7] ss:$0 sm:$0xff]  ;;  %v978_v50 = vld [vmem:[#allocation5 + $0x3] ss:$0 sm:$0xff]  ;;  %v976_v59 = vld [vmem:[#allocation7 + $0x2] ss:$0 sm:$0xff] }
  0x65   : > { %1007 = vmatprep.subr.mxu0 %v1324_v30  ;;  %1012 = vmatprep.subr.mxu1 %v1324_v30  ;;  %v710_v56 = vld [vmem:[#allocation8 + $0x18] sm:$0xff]  ;;  %vm793_vm2 = vcmask 261120   ;;  %s965_s9 = sshll.u32 %s1503_s16, 3  ;;  %s985_s17 = sshll.u32 %s1306_s27, 7 }
  0x66   : > { %367 = vadd.xlane.f32.xlu0 %v366_v6  ;;  %379 = vadd.xlane.f32.xlu1 %v378_v7  ;;  %v979_v60 = vld [vmem:[#allocation7 + $0x3] ss:$0 sm:$0xff]  ;;  %s357_s30 = scalar_lea.vmem [#allocation10], %s965_s9  ;;  %s838_s3 = scalar_lea.hbm %s1595_s7, %s985_s17 }
  0x67   : > { %s840_s19 = sshll.u32 %s357_s30, 4  ;;  %s826_s22 = scalar_lea.sflag [#allocation4], %s1503_s16  ;;  %s841_s19 = int_to_ptr.vmem [resolvable:$true] %s840_s19 }
  0x68   : > { %s1226_s23 = scalar_lea.vmem %s841_s19, 128  ;;  %s1326_s1 = smov [#allocation10]  }
  0x69   : > { %p1227_p10 = scmp.ne.s32.totalorder %s841_s19, %s1226_s23  ;;  %s1230_s2 = sshll.u32 %s1326_s1, 4  ;;  %s1231_s2 = int_to_ptr.vmem [resolvable:$false] %s1230_s2 }
  0x6a   : > { %s1232_s27 = scalar_lea.vmem %s1231_s2, 256  ;;  %p1233_p7 = scmp.lt.s32.totalorder %s841_s19, %s1231_s2 }
  0x6b   : > { %p1228_p2 = pnand %p1227_p10, %p1470_p0  ;;  %p1234_p6 = scmp.lt.s32.totalorder %s1232_s27, %s1226_s23 }
  0x6d   : > { %p1229_p11 = pneg %p1228_p2  ;;  %p1235_p9 = por %p1234_p6, %p1233_p7 }
  0x6f   : > { %p1236_p13 = pnand %p1235_p9, %p1229_p11 }
  0xeb   : > { %v362_v8 = vpop.xlane.xlu0 %361  ;;  %v374_v9 = vpop.xlane.xlu1 %373 }
  0xef   : > { %v368_v10 = vpop.xlane.xlu0 %367  ;;  %v380_v12 = vpop.xlane.xlu1 %379 }
  0xf0   : > { %v369_v11 = vadd.f32 %v368_v10, %v362_v8 }
  0xf2   : > { %v375_v13 = vadd.f32 %v374_v9, %v369_v11  ;;  %v981_v9 = vld [vmem:[%s1592_s4] ss:$0 sm:$0xff] }
  0xf4   : > { %v381_v14 = vadd.f32 %v380_v12, %v375_v13 }
  0xf6   : > { %v382_v15 = vmul.f32 0.03125, %v381_v14 }
  0xf8   : > { %v389_v16 = vsub.f32 %v966_v2, %v382_v15  ;;  %v383_v17 = vsub.f32 %v358_v0, %v382_v15  ;;  %v401_v18 = vsub.f32 %v968_v5, %v382_v15  ;;  %v395_v19 = vsub.f32 %v967_v1, %v382_v15 }
  0xfa   : > { %v390_v20 = vmul.f32 %v389_v16, %v389_v16  ;;  %v384_v21 = vmul.f32 %v383_v17, %v383_v17  ;;  %v402_v24 = vmul.f32 %v401_v18, %v401_v18  ;;  %v396_v25 = vmul.f32 %v395_v19, %v395_v19 }
  0xfc   : > { %v391_v22 = vsel %vm359_vm0, %v390_v20, 0.0  ;;  %v385_v23 = vsel %vm359_vm0, %v384_v21, 0.0  ;;  %v403_v26 = vsel %vm359_vm0, %v402_v24, 0.0  ;;  %v397_v27 = vsel %vm359_vm0, %v396_v25, 0.0  ;;  %v983_v24 = vld [vmem:[%s1594_s6] ss:$0 sm:$0xff] }
  0xfd   : > { %392 = vadd.xlane.f32.xlu1 %v391_v22  ;;  %386 = vadd.xlane.f32.xlu0 %v385_v23  ;;  %v982_v22 = vld [vmem:[%s1593_s5] ss:$0 sm:$0xff] }
 0x101   : > { %404 = vadd.xlane.f32.xlu1 %v403_v26  ;;  %398 = vadd.xlane.f32.xlu0 %v397_v27 }
 0x186   : > { %v393_v31 = vpop.xlane.xlu1 %392  ;;  %v387_v32 = vpop.xlane.xlu0 %386 }
 0x187   : > { %v394_v33 = vadd.f32 %v393_v31, %v387_v32 }
 0x18a   : > { %v399_v34 = vpop.xlane.xlu0 %398  ;;  %v405_v36 = vpop.xlane.xlu1 %404 }
 0x18b   : > { %v400_v35 = vadd.f32 %v399_v34, %v394_v33 }
 0x18d   : > { %v406_v37 = vadd.f32 %v405_v36, %v400_v35 }
 0x18f   : > { %v407_v38 = vmul.f32 0.03125, %v406_v37 }
 0x191   : > { %v408_v39 = vadd.f32 1e-05, %v407_v38 }
 0x193   : > { %1116 = vrsqrt.f32 %v408_v39 }
 0x1a0   : > { %v1117_v40 = vpop.eup %1116 }
 0x1a1   : > { %v428_v43 = vmul.f32 %v1117_v40, %v389_v16  ;;  %v410_v44 = vmul.f32 %v1117_v40, %v383_v17  ;;  %v595_v45 = vmul.f32 %v1117_v40, %v395_v19  ;;  %v690_v47 = vmul.f32 %v1117_v40, %v401_v18 }
 0x1a3   : > { %v437_v51 = vmul.f32 %v971_v41, %v428_v43  ;;  %v418_v52 = vmul.f32 %v969_v42, %v410_v44  ;;  %v604_v57 = vmul.f32 %v975_v46, %v595_v45  ;;  %v699_v58 = vmul.f32 %v978_v50, %v690_v47 }
 0x1a5   : > { %v446_v53 = vadd.f32 %v972_v48, %v437_v51  ;;  %v426_v54 = vadd.f32 %v970_v49, %v418_v52  ;;  %v613_v61 = vadd.f32 %v976_v59, %v604_v57  ;;  %v708_v62 = vadd.f32 %v979_v60, %v699_v58 }
 0x1a7   : > { %1000 = vmatmul.mubr.msk.f32.vlgmr.msra.gmra.mxu0 %vm359_vm0, %v446_v53  ;;  %1005 = vmatmul.mubr.msk.f32.vlgmr.msra.gmra.mxu1 %vm359_vm0, %v426_v54 }
 0x1a8   : > { %1008 = vmatpush3.msra.mxu0 %v615_v55  ;;  %1013 = vmatpush3.msra.mxu1 %v710_v56 }
 0x1a9   : > { %1009 = vmatprep.mubr.msk.f32.mxu0 %vm1325_vm1, %v1324_v30  ;;  %1014 = vmatprep.mubr.msk.f32.mxu1 %vm1325_vm1, %v1324_v30 }
 0x1ab   : > { %1010 = vmatmul.mubr.msk.f32.vlgmr.msra.gmra.mxu0 %vm359_vm0, %v613_v61  ;;  %1015 = vmatmul.mubr.msk.f32.vlgmr.msra.gmra.mxu1 %vm359_vm0, %v708_v62 }
 0x267   : > { %v518_v63 = vpop.f32.mrf.mxu0  ;;  %v591_v0 = vpop.f32.mrf.mxu1 }
 0x268   : > { %v592_v3 = vadd.f32 %v591_v0, %v518_v63 }
 0x269   : > { %v1001_v1 = vpop.f32.mrf.mxu0  ;;  %v1006_v2 = vpop.f32.mrf.mxu1 }
 0x26b   : > { %v685_v4 = vpop.f32.mrf.mxu0  ;;  %v780_v5 = vpop.f32.mrf.mxu1 }
 0x26c   : > { %v689_v6 = vadd.f32 %v685_v4, %v592_v3 }
 0x26d   : > { %v1011_v7 = vpop.f32.mrf.mxu0  ;;  %v1016_v8 = vpop.f32.mrf.mxu1 }
 0x26e   : > { %v784_v10 = vadd.f32 %v780_v5, %v689_v6 }
 0x270   : > { %v792_v11 = vadd.f32 %v981_v9, %v784_v10 }
 0x272   : > { %v794_v12 = vsel %vm793_vm2, %v792_v11, 0.0 }
 0x273   : > { %795 = vadd.xlane.f32.xlu0 %v794_v12 }
 0x2fc   : > { %v796_v13 = vpop.xlane.xlu0 %795 }
 0x2fd   : > { %v798_v14 = vmul.f32 0.03125, %v796_v13 }
 0x2ff   : > { %v799_v15 = vsub.f32 %v792_v11, %v798_v14 }
 0x301   : > { %v800_v16 = vmul.f32 %v799_v15, %v799_v15 }
 0x303   : > { %v801_v17 = vsel %vm793_vm2, %v800_v16, 0.0 }
 0x304   : > { %802 = vadd.xlane.f32.xlu1 %v801_v17 }
 0x38d   : > { %v803_v18 = vpop.xlane.xlu1 %802 }
 0x38e   : > { %v804_v19 = vmul.f32 0.03125, %v803_v18 }
 0x390   : > { %v805_v20 = vadd.f32 1e-05, %v804_v19 }
 0x392   : > { %1118 = vrsqrt.f32 %v805_v20 }
 0x39f   : > { %v1119_v21 = vpop.eup %1118 }
 0x3a0   : > { %v807_v23 = vmul.f32 %v1119_v21, %v799_v15 }
 0x3a2   : > { %v815_v25 = vmul.f32 %v982_v22, %v807_v23 }
 0x3a4   : > { %v823_v26 = vadd.f32 %v983_v24, %v815_v25 }
 0x3a6   : > { %824 = vst.msk [vmem:[%s357_s30] sm:$0xff] %vm793_vm2, %v823_v26 }
 0x3a7   : > { %1239 = shalt.err (!%p1236_p13)
}
 0x3a8   : > { %s1240_s9 = scalar_lea.hbm %s838_s3, 128  ;;  %s1244_s13 = scalar_lea.hbm %s1595_s7, 256 }
 0x3a9   : > { %p1241_p1 = scmp.ne.s32.totalorder %s838_s3, %s1240_s9  ;;  %p1245_p12 = scmp.lt.s32.totalorder %s838_s3, %s1595_s7 }
 0x3aa   : > { %p1246_p5 = scmp.lt.s32.totalorder %s1244_s13, %s1240_s9 }
 0x3ab   : > { %p1242_p4 = pnand %p1241_p1, %p1470_p0 }
 0x3ac   : > { %p1247_p3 = por %p1246_p5, %p1245_p12 }
 0x3ad   : > { %p1243_p8 = pneg %p1242_p4 }
 0x3af   : > { %p1248_p10 = pnand %p1247_p3, %p1243_p8 }
 0x3b1   : > { %1251 = shalt.err (!%p1248_p10)
}
 0x3b2   : > { %1031 = dma.vmem_to_hbm [thread:$0]  (%p1470_p0), %s841_s19, 128, %s838_s3, %s826_s22  }
 0x3b3 PF: > { %s852_s17 = sand.u32 1, %s1294_s24   ;;  %p1621_p2 = scmp.ne.s32.totalorder %s1608_s12, 0 }
 0x3b4   : > { %p1622_p11 = scmp.ge.s32.totalorder %s1314_s29, 2  ;;  %s853_s30 = scalar_lea.sflag [#allocation4], %s852_s17 }
 0x3b6   : > { %p1048_p7 = pnand %p1622_p11, %p1621_p2 }
 0x3b8   : > { %p1049_p6 = pneg %p1048_p7 }
 0x3ba   : > { %1289 = dma.done.wait (%p1049_p6), %s853_s30, 128  }
 0x3bb   : > { %1291 = vsyncadd (%p1049_p6), %s853_s30, 4294967168  ;;  %s25_s29 = sadd.s32 1, %s1314_s29   ;;  %s1623_s24 = smov %s1298_s25 }
 0x3bc   : > { %p22_p9 = scmp.ge.s32.totalorder %s25_s29, 4   ;;  %s1624_s25 = smov %s1302_s26 }
 0x3bd   : > { %s1625_s26 = smov %s1482_s15  ;;  %s1626_s27 = smov %s1310_s28 }
 0x3be   : > { %s1627_s28 = smov %s1629_s8  ;;  %24 = sbr.rel (!%p22_p9) target bundleno = 12 (0xc), region = 117 }
 0x3c3   :  { %858 = vsyncpa [#allocation3], 1 }
 0x3c4   :  { %860 = vsyncpa [#allocation3 + $0x1], 1 }
 0x3c5   :  { %861 = vsyncpa [#allocation6], 1 }
 0x3c6   :  { %862 = vsyncpa [#allocation9], 1 }
 0x3c7   :  { %863 = vsyncpa [#allocation4], 1 }
 0x3c8   :  { %865 = vsyncpa [#allocation4 + $0x1], 1 }

</bundles_post_ra>
